<compile_context>
chip_gen: v7x
topology: tpu7x:2x2x1
jax: 0.10.0
libtpu: 0.0.40
codegen_flags: <defaults>
</compile_context>

<pallas_src>
import functools

import jax
import jax.numpy as jnp
from jax.experimental import pallas as pl
from jax.experimental.pallas import tpu as pltpu


def _round_up(x, m):
    return ((x + m - 1) // m) * m


def _choose_tile_n(n, c, itemsize, *, budget_bytes=8 << 20, max_tile=2048):
    """Largest row tile whose double-buffered inputs fit a conservative VMEM budget."""
    per_row = c * itemsize + 4              # y_pred row + int32 label
    tile = budget_bytes // (2 * per_row)    # 2 pipeline buffers per input
    tile = max(8, min(tile, max_tile, _round_up(n, 8)))
    return max(8, (tile // 8) * 8)          # keep sublane-aligned


def _accuracy_loss_kernel(y_true_ref, y_pred_ref, out_ref, acc_ref, *,
                          n_rows, tile_n, batch_size):
    """Streams row tiles, accumulating sum_n y_pred[n, y_true[n]] in f32 SMEM."""
    step = pl.program_id(0)

    @pl.when(step == 0)
    def _init():
        acc_ref[0] = jnp.float32(0.0)

    yt = y_true_ref[...]                                    # (tile_n, 1) int32
    yp = y_pred_ref[...]                                    # (tile_n, C) native dtype

    cls = jax.lax.broadcasted_iota(jnp.int32, yp.shape, 1)  # class id per lane
    row = jax.lax.broadcasted_iota(jnp.int32, yp.shape, 0)  # row id within tile
    valid = (step * tile_n + row) < n_rows                  # mask padded tail rows
    hit = (cls == yt) & valid                               # one-hot hit + validity

    # Single VPU select, f32 accumulation (no int->float cast, no extra mul).
    contrib = jnp.where(hit, yp.astype(jnp.float32), 0.0)
    acc_ref[0] = acc_ref[0] + jnp.sum(contrib)

    @pl.when(step == pl.num_programs(0) - 1)
    def _finalize():
        out_ref[0] = -(acc_ref[0] / jnp.float32(batch_size))


def accuracy_loss(y_true, y_pred, *, batch_size=1, tile_n=None):
    """Pallas wrapper. y_true: (N,) int, y_pred: (N, C) float (any float dtype)."""
    n, c = y_pred.shape
    y_true_2d = y_true.reshape(n, 1).astype(jnp.int32)

    if tile_n is None:
        tile_n = _choose_tile_n(n, c, jnp.dtype(y_pred.dtype).itemsize)
    grid = (pl.cdiv(n, tile_n),)

    kernel = functools.partial(_accuracy_loss_kernel, n_rows=n,
                               tile_n=tile_n, batch_size=batch_size)

    out = pl.pallas_call(
        kernel,
        out_shape=jax.ShapeDtypeStruct((1,), jnp.float32),
        grid_spec=pltpu.PrefetchScalarGridSpec(
            num_scalar_prefetch=0,
            grid=grid,
            in_specs=[
                pl.BlockSpec((tile_n, 1), lambda i: (i, 0)),   # y_true tile
                pl.BlockSpec((tile_n, c), lambda i: (i, 0)),   # y_pred tile (native dtype)
            ],
            out_specs=pl.BlockSpec(memory_space=pltpu.SMEM),   # scalar loss, resident
            scratch_shapes=[pltpu.SMEM((1,), jnp.float32)],    # running f32 sum
        ),
        compiler_params=pltpu.CompilerParams(
            dimension_semantics=("arbitrary",),                # reduction axis
            vmem_limit_bytes=32 * 1024 * 1024,
        ),
    )(y_true_2d, y_pred)
    return out[0]


def _accuracy_loss_ref(y_true, y_pred, *, batch_size=1):
    """Pure-JAX reference mirroring F.one_hot(y_true) * y_pred semantics (f32 accum)."""
    onehot = jax.nn.one_hot(y_true, y_pred.shape[1], dtype=jnp.float32)
    return -(jnp.sum(onehot * y_pred.astype(jnp.float32)) / batch_size)


if __name__ == "__main__":
    key = jax.random.PRNGKey(0)
    k1, k2, k3, k4 = jax.random.split(key, 4)

    # Case 1: f32, N=100 with a forced small tile -> exercises multi-tile
    # accumulation across the grid AND tail-row masking on the padded last tile.
    N, C, batch_size = 100, 4, 4
    y_pred = jax.nn.softmax(jax.random.normal(k1, (N, C), dtype=jnp.float32), axis=1)
    y_true = jax.random.randint(k2, (N,), 0, C, dtype=jnp.int32)
    loss = jax.block_until_ready(
        accuracy_loss(y_true, y_pred, batch_size=batch_size, tile_n=16))
    ref = _accuracy_loss_ref(y_true, y_pred, batch_size=batch_size)
    assert jnp.allclose(loss, ref, rtol=1e-6, atol=1e-6), (loss, ref)

    # Case 2: bf16 streamed in native dtype (no wrapper upcast), default tile sizing.
    N2, C2 = 64, 8
    y_pred2 = jax.nn.softmax(
        jax.random.normal(k3, (N2, C2), dtype=jnp.float32), axis=1).astype(jnp.bfloat16)
    y_true2 = jax.random.randint(k4, (N2,), 0, C2, dtype=jnp.int32)
    loss2 = jax.block_until_ready(accuracy_loss(y_true2, y_pred2, batch_size=1))
    ref2 = _accuracy_loss_ref(y_true2, y_pred2, batch_size=1)
    assert jnp.allclose(loss2, ref2, rtol=1e-5, atol=1e-5), (loss2, ref2)

    print("KERNEL_OK")
</pallas_src>

<mosaic_0001>
module attributes {stable_mosaic.version = 11 : i64} {
  func.func @_accuracy_loss_kernel(%arg0: i32, %arg1: memref<16x1xi32, #tpu.memory_space<vmem>>, %arg2: memref<16x4xf32, #tpu.memory_space<vmem>>, %arg3: memref<1xf32, #tpu.memory_space<smem>>, %arg4: memref<1xf32, #tpu.memory_space<smem>>) attributes {dimension_semantics = [#tpu.dimension_semantics<arbitrary>], iteration_bounds = array<i64: 7>, scalar_prefetch = 0 : i64, scratch_operands = 1 : i64, tpu.core_type = #tpu.core_type<tc>, window_params = [{transform_indices = @transform_0, window_bounds = array<i64: 16, 1>}, {transform_indices = @transform_1, window_bounds = array<i64: 16, 4>}, {transform_indices = @transform_2, window_bounds = array<i64: 1>}]} {
    %c0_i32 = arith.constant 0 : i32
    %0 = arith.cmpi eq, %arg0, %c0_i32 : i32
    %1 = arith.extui %0 : i1 to i32
    %c0_i32_0 = arith.constant 0 : i32
    %2 = arith.cmpi ne, %1, %c0_i32_0 : i32
    scf.if %2 {
      %cst_8 = arith.constant 0.000000e+00 : f32
      %c0_9 = arith.constant 0 : index
      %27 = memref.load %arg4[%c0_9] : memref<1xf32, #tpu.memory_space<smem>>
      memref.store %cst_8, %arg4[%c0_9] : memref<1xf32, #tpu.memory_space<smem>>
    } else {
    }
    %c0 = arith.constant 0 : index
    %c0_1 = arith.constant 0 : index
    %3 = vector.load %arg1[%c0, %c0_1] : memref<16x1xi32, #tpu.memory_space<vmem>>, vector<16x1xi32>
    %c0_2 = arith.constant 0 : index
    %c0_3 = arith.constant 0 : index
    %4 = vector.load %arg2[%c0_2, %c0_3] : memref<16x4xf32, #tpu.memory_space<vmem>>, vector<16x4xf32>
    %5 = tpu.iota {dimensions = array<i32: 1>} : vector<16x4xi32>
    %6 = tpu.iota {dimensions = array<i32: 0>} : vector<16x4xi32>
    %c16_i32 = arith.constant 16 : i32
    %7 = arith.muli %arg0, %c16_i32 : i32
    %8 = vector.broadcast %7 : i32 to vector<16x4xi32>
    %9 = arith.addi %8, %6 : vector<16x4xi32>
    %c100_i32 = arith.constant 100 : i32
    %10 = vector.broadcast %c100_i32 : i32 to vector<16x4xi32>
    %11 = arith.cmpi slt, %9, %10 : vector<16x4xi32>
    %12 = vector.broadcast %3 : vector<16x1xi32> to vector<16x4xi32>
    %13 = arith.cmpi eq, %5, %12 : vector<16x4xi32>
    %14 = arith.andi %13, %11 : vector<16x4xi1>
    %cst = arith.constant 0.000000e+00 : f32
    %15 = vector.broadcast %cst : f32 to vector<16x4xf32>
    %16 = arith.select %14, %4, %15 : vector<16x4xi1>, vector<16x4xf32>
    %c0_4 = arith.constant 0 : index
    %17 = memref.load %arg4[%c0_4] : memref<1xf32, #tpu.memory_space<smem>>
    %18 = vector.shape_cast %16 : vector<16x4xf32> to vector<1x16x4xf32>
    %cst_5 = arith.constant dense<0.000000e+00> : vector<1xf32>
    %19 = vector.multi_reduction <add>, %18, %cst_5 [1, 2] : vector<1x16x4xf32> to vector<1xf32>
    %20 = vector.shape_cast %19 : vector<1xf32> to vector<1x1x1xf32>
    %21 = vector.extract %20[0, 0, 0] : f32 from vector<1x1x1xf32>
    %22 = arith.addf %17, %21 : f32
    %c0_6 = arith.constant 0 : index
    %23 = memref.load %arg4[%c0_6] : memref<1xf32, #tpu.memory_space<smem>>
    memref.store %22, %arg4[%c0_6] : memref<1xf32, #tpu.memory_space<smem>>
    %c6_i32 = arith.constant 6 : i32
    %24 = arith.cmpi eq, %arg0, %c6_i32 : i32
    %25 = arith.extui %24 : i1 to i32
    %c0_i32_7 = arith.constant 0 : i32
    %26 = arith.cmpi ne, %25, %c0_i32_7 : i32
    scf.if %26 {
      %c0_8 = arith.constant 0 : index
      %27 = memref.load %arg4[%c0_8] : memref<1xf32, #tpu.memory_space<smem>>
      %cst_9 = arith.constant 4.000000e+00 : f32
      %28 = arith.divf %27, %cst_9 : f32
      %cst_10 = arith.constant 0.000000e+00 : f32
      %29 = arith.subf %cst_10, %28 : f32
      %c0_11 = arith.constant 0 : index
      %30 = memref.load %arg3[%c0_11] : memref<1xf32, #tpu.memory_space<smem>>
      memref.store %29, %arg3[%c0_11] : memref<1xf32, #tpu.memory_space<smem>>
    } else {
    }
    return
  }
  func.func @transform_0(%arg0: i32) -> (i32, i32) {
    %c0_i32 = arith.constant 0 : i32
    %c0_i32_0 = arith.constant 0 : i32
    return %arg0, %c0_i32 : i32, i32
  }
  func.func @transform_1(%arg0: i32) -> (i32, i32) {
    %c0_i32 = arith.constant 0 : i32
    %c0_i32_0 = arith.constant 0 : i32
    return %arg0, %c0_i32 : i32, i32
  }
  func.func @transform_2(%arg0: i32) -> i32 {
    %c0_i32 = arith.constant 0 : i32
    %c0_i32_0 = arith.constant 0 : i32
    return %c0_i32 : i32
  }
}

</mosaic_0001>

<bundles_post_ra>
// kernel: tpu_custom_call.1
= control target key start
LH: loop header
LB: loop body
LE: loop exit
PB: predicated region body
PF: predicated region fallthrough
CT: control target
= control target key end

     0   :  { %7 = vsyncpa [#allocation4], 0  ;;  %s395_s9 = smov 0   ;;  %s440_s0 = inlined_call_operand.vmem [shape: s32[100,1], index: 0, kind: input, shape index: {}]   ;;  %s441_s1 = inlined_call_operand.vmem [shape: f32[100,4], index: 1, kind: input, shape index: {}]   ;;  %s442_s2 = inlined_call_operand.hbm [shape: f32[1], index: 2, kind: output, shape index: {}]  }
   0x1 LB: > { %s401_s10 = sadd.s32 4294967295, %s375_s9   ;;  %p315_p0 = scmp.ge.s32.totalorder %s375_s9, 1  ;;  %s375_s9 = sphi %s395_s9, %s13_s9  }
   0x2   : > { %p136_p1 = scmp.lt.s32.totalorder %s375_s9, 8 }
   0x4   : > { %p137_p2 = pnand %p315_p0, %p136_p1 }
   0x5   : > { %s316_s11 = sshll.u32 (!%p137_p2), %s401_s10, 1  ;;  %v377_v0 = vmov (!%p137_p2), 0   ;;  %v204_v3 = vlaneseq (!%p137_p2)  ;;  %s321_s16 = sshll.u32 (!%p137_p2), %s401_s10, 4  ;;  %vm228_vm5 = vcmask (!%p137_p2), 31744  }
   0x6   : > { %140 = sbr.rel (%p137_p2) target bundleno = 372 (0x174), region = 28  ;;  %352 = vset.pattern.permute.xlu0 (!%p137_p2), %v377_v0  ;;  %p171_p3 = scmp.lt.s32.totalorder (!%p137_p2), %s316_s11, 12  ;;  %v210_v5 = vstv (!%p137_p2), %s321_s16 }
   0x7   : > { %v207_v4 = vshrl.u32 (!%p137_p2), %v204_v3, 7  ;;  %v205_v8 = vand.u32 (!%p137_p2), 127, %v204_v3  ;;  %p337_p4 = scmp.eq.s32.totalorder (!%p137_p2), %s401_s10, 0  ;;  %s378_s20 = smov (!%p137_p2), 0.0  }
   0x8   : > { %p338_p5 = scmp.eq.s32.totalorder (!%p137_p2), %s401_s10, 6  ;;  %s353_s28 = scalar_lea.hbm (!%p137_p2), %s442_s2, 16 }
   0x9   : > { %v211_v6 = vadd.s32 (!%p137_p2), %v210_v5, %v207_v4  ;;  %v208_v7 = vadd.s32 (!%p137_p2), 8, %v207_v4  ;;  %p354_p6 = scmp.ne.s32.totalorder (!%p137_p2), %s442_s2, %s353_s28  ;;  %p359_p9 = scmp.lt.u32.totalorder (!%p137_p2), %s353_s28, %s442_s2 }
   0xb   : > { %vm213_vm0 = vcmp.lt.s32.totalorder (!%p137_p2), %v211_v6, 100  ;;  %v212_v9 = vadd.s32 (!%p137_p2), %v210_v5, %v208_v7  ;;  %p355_p7 = pnand (!%p137_p2), %p354_p6, %p338_p5 }
   0xd   : > { %s444_s11 = smov (!%p171_p3, %s316_s11), 12  ;;  %vm214_vm3 = vcmp.lt.s32.totalorder %v212_v9, 100  ;;  %330 = sst [smem:[#allocation2]] (%p337_p4), %s378_s20 }
   0xe   : > { %s317_s12 = sshll.u32 %s444_s11, 3  ;;  %s227_s21 = sld [smem:[#allocation2]] }
   0xf   : > { %s174_s15 = scalar_lea.vmem %s440_s0, %s317_s12  ;;  %s188_s19 = scalar_lea.vmem %s441_s1, %s317_s12 }
  0x10   : > { %v200_v1 = vld [vmem:[%s174_s15] sm:$0xff]  ;;  %v201_v2 = vld [vmem:[%s174_s15 + $0x8] sm:$0xff]  ;;  %p356_p8 = pneg %p355_p7 }
  0x11   : > { %216 = vperm.xlu0 %352, %v200_v1   ;;  %v202_v11 = vld [vmem:[%s188_s19] sm:$0xff]  ;;  %v203_v13 = vld [vmem:[%s188_s19 + $0x8] sm:$0xff] }
  0x12   : > { %p361_p10 = pnand %p359_p9, %p356_p8 }
  0x15   : > { %219 = vperm.xlu0 %352, %v201_v2  }
  0x90   : > { %v217_v10 = vpop.permute.xlu0 %216 }
  0x91   : > { %vm221_vm1 = vcmp.eq.s32.totalorder %v205_v8, %v217_v10 }
  0x92   : > { %vm223_vm2 = vmand %vm221_vm1, %vm213_vm0 }
  0x93   : > { %v225_v14 = vsel %vm223_vm2, %v202_v11, 0.0 }
  0x94   : > { %v220_v12 = vpop.permute.xlu0 %219  ;;  %v229_v16 = vsel %vm228_vm5, %v225_v14, 0.0 }
  0x95   : > { %vm222_vm4 = vcmp.eq.s32.totalorder %v205_v8, %v220_v12 }
  0x96   : > { %vm224_vm6 = vmand %vm222_vm4, %vm214_vm3 }
  0x97   : > { %v226_v15 = vsel %vm224_vm6, %v203_v13, 0.0 }
  0x98   : > { %v230_v17 = vsel %vm228_vm5, %v226_v15, 0.0 }
  0x99   : > { %v231_v18 = vadd.f32 %v230_v17, %v229_v16 }
  0x9b   : > { %232 = vadd.xlane.f32.xlu1 %v231_v18 }
 0x128   : > { %v233_v19 = vpop.xlane.xlu1 %232 }
 0x129   : > { %v234_v20 = vrot.slane %v233_v19, 4 }
 0x12b   : > { %v235_v21 = vadd.f32 %v234_v20, %v233_v19 }
 0x12d   : > { %v236_v22 = vrot.slane %v235_v21, 2 }
 0x12f   : > { %v237_v23 = vadd.f32 %v236_v22, %v235_v21 }
 0x131   : > { %v238_v24 = vrot.slane %v237_v23, 1 }
 0x133   : > { %v239_v25 = vadd.f32 %v238_v24, %v237_v23 }
 0x135   : > { %327 = vpush %v239_v25 }
 0x166   : > { %s328_s22 = spop %327 }
 0x167   : > { %s241_s23 = sadd.f32 %s328_s22, %s227_s21 }
 0x169   : > { %243 = sst [smem:[#allocation2]] %s241_s23  ;;  %s251_s24 = smul.f32 0.25, %s241_s23 }
 0x16b   : > { %s252_s25 = ssub.f32 0.0, %s251_s24 }
 0x16d   : > { %332 = sst [smem:[#allocation3]] (%p338_p5), %s252_s25 }
 0x16e   : > { %364 = shalt.err (!%p361_p10)
}
 0x16f   : > { %s379_s5 = smov [#allocation3]  }
 0x170   : > { %334 = dma.smem_to_hbm (%p338_p5), %s379_s5, 16, %s442_s2, [#allocation4]  }
 0x171   : > { %370 = dma.done.wait (%p338_p5), [#allocation4], 16  }
 0x172   : > { %372 = vsyncadd (%p338_p5), [#allocation4], 4294967280 }
 0x173   : > { %268 = sfence }
 0x174 PF: > { %s13_s9 = sadd.s32 1, %s375_s9  }
 0x175   : > { %p10_p11 = scmp.ge.s32.totalorder %s13_s9, 9  }
 0x177   :  { %12 = sbr.rel (!%p10_p11) target bundleno = 1 (0x1), region = 69 }
 0x17e   :  { %274 = vsyncpa [#allocation4], 1 }
 0x17f   :  { %276 = vsyncpa [#allocation4 + $0x1], 1 }

</bundles_post_ra>
